<compile_context>
chip_gen: v5e
topology: v5e:2x2
jax: 0.10.0
libtpu: 0.0.40
codegen_flags: <defaults>
</compile_context>

<pallas_src>
import functools

import jax
import jax.numpy as jnp
from jax import lax
from jax.experimental import pallas as pl
from jax.experimental.pallas import tpu as pltpu


def _round_up(x, m):
    return ((x + m - 1) // m) * m


def _vmem_capacity_bytes():
    """Per-core VMEM capacity; conservative fallback if the query fails."""
    try:
        return int(pltpu.get_tpu_info().vmem_capacity_bytes)
    except Exception:
        return 64 * 1024 * 1024  # v7x-sized assumption (safe everywhere)


def _choose_tile_and_pad(dim, cap, align, max_waste_frac=0.125):
    """Pick (tile, padded_dim): tile is a multiple of `align` and <= cap (unless
    the whole padded dim is smaller); padded_dim is a multiple of tile.  Prefers
    the largest tile whose padding waste is small, so sizes like 384 keep a
    full-width tile instead of falling back to narrow 128 tiles."""
    base = _round_up(max(dim, 1), align)
    if base <= cap:
        return base, base
    slack = max(int(base * max_waste_frac), align)
    t = (cap // align) * align
    while t >= align:
        pad = _round_up(base, t)
        if pad - base <= slack:
            return t, pad
        t -= align
    return align, base


def _adapter_kernel(weight_is_transposed, x_ref, w_ref, sb_ref, o_ref, acc_ref):
    """One (tm, tn) output tile; K is the last ('arbitrary') reduction axis.

    sb_ref is (2, tn): row 0 = adapter_scale, row 1 = adapter_scale*(bias+adapter_bias).
    """
    k = pl.program_id(2)

    @pl.when(k == 0)
    def _():
        acc_ref[...] = jnp.zeros_like(acc_ref)

    if weight_is_transposed:
        # w_ref is a (tk, tn) tile of W^T (K, N): plain NN matmul on the MXU.
        acc_ref[...] += jnp.dot(x_ref[...], w_ref[...],
                                preferred_element_type=jnp.float32)
    else:
        # w_ref is a (tn, tk) tile of torch-layout W (N, K): contract last dims
        # (A @ B^T — same NT form as flash-attention's q @ k^T).
        acc_ref[...] += lax.dot_general(
            x_ref[...], w_ref[...],
            dimension_numbers=(((1,), (1,)), ((), ())),
            preferred_element_type=jnp.float32)

    @pl.when(k == pl.num_programs(2) - 1)
    def _():
        # Fused epilogue: o = scale * acc + scale*(bias + adapter_bias)
        scale = sb_ref[0:1, :]
        comb = sb_ref[1:2, :]
        o_ref[...] = (scale * acc_ref[...] + comb).astype(o_ref.dtype)


@functools.partial(jax.jit, static_argnames=("compute_dtype", "weight_is_transposed"))
def adapter_v2_linear(x, weight, bias, adapter_bias, adapter_scale,
                      *, compute_dtype=None, weight_is_transposed=False):
    """x: (..., in_features).

    weight: (out_features, in_features) torch layout (default), or
            (in_features, out_features) when weight_is_transposed=True
            (for callers that cache W^T across calls).
    compute_dtype: optional (e.g. jnp.bfloat16) cast of x/W for the matmul;
            accumulation stays f32; output keeps x.dtype.
    """
    *lead, K = x.shape
    if weight_is_transposed:
        Kw, N = weight.shape
    else:
        N, Kw = weight.shape
    if Kw != K:
        raise ValueError("weight shape does not match x's feature dimension")

    M = 1
    for d in lead:
        M *= d
    out_dtype = x.dtype
    if M == 0:
        return jnp.zeros((*lead, N), out_dtype)

    # ---- fold epilogue: scale*(xW^T + b + ab) == scale*(xW^T) + scale*(b+ab) ----
    scale = jnp.broadcast_to(jnp.asarray(adapter_scale, jnp.float32).reshape(-1), (N,))
    ab = jnp.broadcast_to(jnp.asarray(adapter_bias, jnp.float32).reshape(-1), (N,))
    if bias is None:
        b = jnp.zeros((N,), jnp.float32)
    else:
        b = jnp.broadcast_to(jnp.asarray(bias, jnp.float32).reshape(-1), (N,))
    sb = jnp.stack([scale, scale * (b + ab)], axis=0)  # (2, N) f32

    x2 = x.reshape(M, K)
    w2 = weight
    if compute_dtype is not None:
        x2 = x2.astype(compute_dtype)
        w2 = w2.astype(compute_dtype)

    # ---- generation-aware tile caps & VMEM budget ----
    cap = _vmem_capacity_bytes()
    if cap >= 100 * 1024 * 1024:          # v5e / v6e: 128 MiB VMEM
        tm_cap, tn_cap, tk_cap = 1024, 1024, 2048
    elif cap >= 48 * 1024 * 1024:         # v7x: 64 MiB VMEM (or unknown)
        tm_cap, tn_cap, tk_cap = 1024, 1024, 1024
    else:                                 # very small VMEM (old generations)
        tm_cap, tn_cap, tk_cap = 512, 512, 512
    # Worst-case double-buffered tiles at these caps stay far below the limit.
    vmem_limit = max(min(int(cap * 0.7), 112 * 1024 * 1024), 8 * 1024 * 1024)

    tm, M_pad = _choose_tile_and_pad(M, tm_cap, 8)
    tn, N_pad = _choose_tile_and_pad(N, tn_cap, 128)
    tk, K_pad = _choose_tile_and_pad(K, tk_cap, 128)

    # Guarantee >= 2 parallel (M, N) grid steps when possible so both of v7x's
    # TensorCores get work and DMA overlaps compute even when K fits one tile.
    # Harmless on single-core v5e/v6e.
    if (M_pad // tm) * (N_pad // tn) < 2:
        if tn % 256 == 0:
            tn //= 2
        elif tm % 16 == 0:
            tm //= 2

    # ---- pad operands to tile multiples (zero padding is trimmed afterwards) ----
    if (M_pad, K_pad) != (M, K):
        x2 = jnp.pad(x2, ((0, M_pad - M), (0, K_pad - K)))
    if weight_is_transposed:
        if (K_pad, N_pad) != (K, N):
            w2 = jnp.pad(w2, ((0, K_pad - K), (0, N_pad - N)))
        w_spec = pl.BlockSpec((tk, tn), lambda i, j, k: (k, j))
    else:
        if (N_pad, K_pad) != (N, K):
            w2 = jnp.pad(w2, ((0, N_pad - N), (0, K_pad - K)))
        w_spec = pl.BlockSpec((tn, tk), lambda i, j, k: (j, k))
    if N_pad != N:
        sb = jnp.pad(sb, ((0, 0), (0, N_pad - N)))

    grid = (M_pad // tm, N_pad // tn, K_pad // tk)

    out2 = pl.pallas_call(
        functools.partial(_adapter_kernel, weight_is_transposed),
        out_shape=jax.ShapeDtypeStruct((M_pad, N_pad), out_dtype),
        grid_spec=pltpu.PrefetchScalarGridSpec(
            num_scalar_prefetch=0,
            grid=grid,
            in_specs=[
                pl.BlockSpec((tm, tk), lambda i, j, k: (i, k)),   # x tile
                w_spec,                                           # W tile
                pl.BlockSpec((2, tn), lambda i, j, k: (0, j)),    # [scale; scale*(b+ab)]
            ],
            out_specs=pl.BlockSpec((tm, tn), lambda i, j, k: (i, j)),
            scratch_shapes=[pltpu.VMEM((tm, tn), jnp.float32)],
        ),
        compiler_params=pltpu.CompilerParams(
            dimension_semantics=("parallel", "parallel", "arbitrary"),
            vmem_limit_bytes=vmem_limit,
        ),
    )(x2, w2, sb)

    return out2[:M, :N].reshape(*lead, N)


if __name__ == "__main__":
    # --- 1) small shapes consistent with the module: batch=2, seq=8, 256 -> 256 ---
    batch, seq, in_features, out_features = 2, 8, 256, 256
    kx, kw, kb = jax.random.split(jax.random.PRNGKey(0), 3)

    x = jax.random.normal(kx, (batch, seq, in_features), dtype=jnp.float32)
    bound = 1.0 / (in_features ** 0.5)     # torch.nn.Linear init range
    weight = jax.random.uniform(kw, (out_features, in_features),
                                minval=-bound, maxval=bound, dtype=jnp.float32)
    lin_bias = jax.random.uniform(kb, (out_features,),
                                  minval=-bound, maxval=bound, dtype=jnp.float32)
    adapter_bias = jnp.zeros((out_features,), dtype=jnp.float32)    # module init
    adapter_scale = jnp.ones((out_features,), dtype=jnp.float32)    # module init

    out = adapter_v2_linear(x, weight, lin_bias, adapter_bias, adapter_scale)
    out = jax.block_until_ready(out)
    ref = adapter_scale * (
        jnp.einsum("bsk,nk->bsn", x, weight, precision=lax.Precision.HIGHEST)
        + lin_bias + adapter_bias)
    assert out.shape == (batch, seq, out_features)
    assert jnp.allclose(out, ref, atol=1e-4, rtol=1e-4), "small-case mismatch"

    # --- 2) larger case: multi-step K accumulation + parallel N tiles ---
    b2, s2, k2, n2 = 2, 512, 4096, 512
    kx2, kw2, kb2, ks2 = jax.random.split(jax.random.PRNGKey(1), 4)
    x_big = jax.random.normal(kx2, (b2, s2, k2), dtype=jnp.float32)
    bound2 = 1.0 / (k2 ** 0.5)
    w_big = jax.random.uniform(kw2, (n2, k2), minval=-bound2, maxval=bound2,
                               dtype=jnp.float32)
    b_big = jax.random.uniform(kb2, (n2,), minval=-bound2, maxval=bound2,
                               dtype=jnp.float32)
    ab_big = 0.01 * jax.random.normal(ks2, (n2,), dtype=jnp.float32)
    as_big = jnp.full((n2,), 1.5, dtype=jnp.float32)

    out_big = jax.block_until_ready(
        adapter_v2_linear(x_big, w_big, b_big, ab_big, as_big))
    ref_big = as_big * (
        jnp.einsum("bsk,nk->bsn", x_big, w_big, precision=lax.Precision.HIGHEST)
        + b_big + ab_big)
    assert out_big.shape == (b2, s2, n2)
    assert jnp.allclose(out_big, ref_big, atol=5e-3, rtol=5e-3), "tiled-path mismatch"

    # --- 3) bf16 compute path + cached-transposed (K, N) weight layout ---
    batch3, seq3, kdim3, ndim3 = 2, 8, 128, 384
    kx3, kw3, kb3 = jax.random.split(jax.random.PRNGKey(2), 3)
    x3 = jax.random.normal(kx3, (batch3, seq3, kdim3), dtype=jnp.float32)
    bound3 = 1.0 / (kdim3 ** 0.5)
    w3 = jax.random.uniform(kw3, (ndim3, kdim3), minval=-bound3, maxval=bound3,
                            dtype=jnp.float32)
    bias3 = jax.random.uniform(kb3, (ndim3,), minval=-bound3, maxval=bound3,
                               dtype=jnp.float32)
    ab3 = jnp.zeros((ndim3,), jnp.float32)
    as3 = jnp.full((ndim3,), 0.5, dtype=jnp.float32)

    out3 = jax.block_until_ready(
        adapter_v2_linear(x3, w3.T, bias3, ab3, as3,
                          compute_dtype=jnp.bfloat16, weight_is_transposed=True))
    ref3 = as3 * (
        jnp.einsum("bsk,nk->bsn", x3, w3, precision=lax.Precision.HIGHEST)
        + bias3 + ab3)
    assert out3.shape == (batch3, seq3, ndim3)
    assert jnp.allclose(out3, ref3, atol=5e-2, rtol=5e-2), "bf16/transposed mismatch"

    print("KERNEL_OK")
</pallas_src>

<mosaic_0001>
module attributes {stable_mosaic.version = 11 : i64} {
  func.func @_adapter_kernel(%arg0: i32, %arg1: i32, %arg2: i32, %arg3: memref<16x256xf32, #tpu.memory_space<vmem>>, %arg4: memref<128x256xf32, #tpu.memory_space<vmem>>, %arg5: memref<2x128xf32, #tpu.memory_space<vmem>>, %arg6: memref<16x128xf32, #tpu.memory_space<vmem>>, %arg7: memref<16x128xf32, #tpu.memory_space<vmem>>) attributes {dimension_semantics = [#tpu.dimension_semantics<parallel>, #tpu.dimension_semantics<parallel>, #tpu.dimension_semantics<arbitrary>], iteration_bounds = array<i64: 1, 2, 1>, scalar_prefetch = 0 : i64, scratch_operands = 1 : i64, tpu.core_type = #tpu.core_type<tc>, window_params = [{transform_indices = @transform_0, window_bounds = array<i64: 16, 256>}, {transform_indices = @transform_1, window_bounds = array<i64: 128, 256>}, {transform_indices = @transform_2, window_bounds = array<i64: 2, 128>}, {transform_indices = @transform_3, window_bounds = array<i64: 16, 128>}]} {
    %c0_i32 = arith.constant 0 : i32
    %0 = arith.cmpi eq, %arg2, %c0_i32 : i32
    %1 = arith.extui %0 : i1 to i32
    %c0_i32_0 = arith.constant 0 : i32
    %2 = arith.cmpi ne, %1, %c0_i32_0 : i32
    scf.if %2 {
      %cst_10 = arith.constant 0.000000e+00 : f32
      %12 = vector.broadcast %cst_10 : f32 to vector<16x128xf32>
      %c0_11 = arith.constant 0 : index
      %c0_12 = arith.constant 0 : index
      %13 = vector.load %arg7[%c0_11, %c0_12] : memref<16x128xf32, #tpu.memory_space<vmem>>, vector<16x128xf32>
      tpu.vector_store %arg7[%c0_11, %c0_12], %12 {strides = array<i32>} : memref<16x128xf32, #tpu.memory_space<vmem>>, vector<16x128xf32>,
    } else {
    }
    %c0 = arith.constant 0 : index
    %c0_1 = arith.constant 0 : index
    %3 = vector.load %arg7[%c0, %c0_1] : memref<16x128xf32, #tpu.memory_space<vmem>>, vector<16x128xf32>
    %c0_2 = arith.constant 0 : index
    %c0_3 = arith.constant 0 : index
    %4 = vector.load %arg3[%c0_2, %c0_3] : memref<16x256xf32, #tpu.memory_space<vmem>>, vector<16x256xf32>
    %c0_4 = arith.constant 0 : index
    %c0_5 = arith.constant 0 : index
    %5 = vector.load %arg4[%c0_4, %c0_5] : memref<128x256xf32, #tpu.memory_space<vmem>>, vector<128x256xf32>
    %cst = arith.constant dense<0.000000e+00> : vector<16x128xf32>
    %6 = tpu.matmul %4, %5, %cst {dimension_numbers = #tpu.dot_dimension_numbers<[1], [1], [0], [0], [0, 0, 1, 0], [], []>} : vector<16x256xf32>, vector<128x256xf32>, vector<16x128xf32> -> vector<16x128xf32>
    %7 = arith.addf %3, %6 : vector<16x128xf32>
    %c0_6 = arith.constant 0 : index
    %c0_7 = arith.constant 0 : index
    %8 = vector.load %arg7[%c0_6, %c0_7] : memref<16x128xf32, #tpu.memory_space<vmem>>, vector<16x128xf32>
    tpu.vector_store %arg7[%c0_6, %c0_7], %7 {strides = array<i32>} : memref<16x128xf32, #tpu.memory_space<vmem>>, vector<16x128xf32>,
    %c0_i32_8 = arith.constant 0 : i32
    %9 = arith.cmpi eq, %arg2, %c0_i32_8 : i32
    %10 = arith.extui %9 : i1 to i32
    %c0_i32_9 = arith.constant 0 : i32
    %11 = arith.cmpi ne, %10, %c0_i32_9 : i32
    scf.if %11 {
      %c0_10 = arith.constant 0 : index
      %c0_11 = arith.constant 0 : index
      %12 = vector.load %arg5[%c0_10, %c0_11] : memref<2x128xf32, #tpu.memory_space<vmem>>, vector<1x128xf32>
      %c1 = arith.constant 1 : index
      %c0_12 = arith.constant 0 : index
      %13 = vector.load %arg5[%c1, %c0_12] : memref<2x128xf32, #tpu.memory_space<vmem>>, vector<1x128xf32>
      %c0_13 = arith.constant 0 : index
      %c0_14 = arith.constant 0 : index
      %14 = vector.load %arg7[%c0_13, %c0_14] : memref<16x128xf32, #tpu.memory_space<vmem>>, vector<16x128xf32>
      %15 = vector.broadcast %12 : vector<1x128xf32> to vector<16x128xf32>
      %16 = arith.mulf %15, %14 : vector<16x128xf32>
      %17 = vector.broadcast %13 : vector<1x128xf32> to vector<16x128xf32>
      %18 = arith.addf %16, %17 : vector<16x128xf32>
      %c0_15 = arith.constant 0 : index
      %c0_16 = arith.constant 0 : index
      %19 = vector.load %arg6[%c0_15, %c0_16] : memref<16x128xf32, #tpu.memory_space<vmem>>, vector<16x128xf32>
      tpu.vector_store %arg6[%c0_15, %c0_16], %18 {strides = array<i32>} : memref<16x128xf32, #tpu.memory_space<vmem>>, vector<16x128xf32>,
    } else {
    }
    return
  }
  func.func @transform_0(%arg0: i32, %arg1: i32, %arg2: i32) -> (i32, i32) {
    %c0_i32 = arith.constant 0 : i32
    return %arg0, %arg2 : i32, i32
  }
  func.func @transform_1(%arg0: i32, %arg1: i32, %arg2: i32) -> (i32, i32) {
    %c0_i32 = arith.constant 0 : i32
    return %arg1, %arg2 : i32, i32
  }
  func.func @transform_2(%arg0: i32, %arg1: i32, %arg2: i32) -> (i32, i32) {
    %c0_i32 = arith.constant 0 : i32
    %c0_i32_0 = arith.constant 0 : i32
    return %c0_i32, %arg1 : i32, i32
  }
  func.func @transform_3(%arg0: i32, %arg1: i32, %arg2: i32) -> (i32, i32) {
    %c0_i32 = arith.constant 0 : i32
    return %arg0, %arg1 : i32, i32
  }
}

</mosaic_0001>

<bundles_post_ra>
// kernel: adapter_v2_linear.1
= control target key start
LH: loop header
LB: loop body
LE: loop exit
PB: predicated region body
PF: predicated region fallthrough
CT: control target
= control target key end

     0   :  { %s1015_s0 = inlined_call_operand.hbm [shape: f32[16,256], index: 0, kind: input, shape index: {}]   ;;  %s1016_s1 = inlined_call_operand.hbm [shape: f32[256,256], index: 1, kind: input, shape index: {}]   ;;  %s1017_s2 = inlined_call_operand.vmem [shape: f32[2,256], index: 2, kind: input, shape index: {}]   ;;  %s1018_s3 = inlined_call_operand.hbm [shape: f32[16,256], index: 3, kind: output, shape index: {}]  }
   0x1   :  { %1020 = sst [smem:[#allocation12_spill]] %s1015_s0 }
   0x2   :  { %8 = vsyncpa [#allocation4], 0 }
   0x3   :  { %9 = vsyncpa [#allocation7], 0 }
   0x4   :  { %11 = vsyncpa [#allocation7 + $0x1], 0 }
   0x5   :  { %12 = vsyncpa [#allocation5], 0 }
   0x6   :  { %14 = vsyncpa [#allocation5 + $0x1], 0  ;;  %s820_s12 = smov 0   ;;  %s822_s13 = smov 0  }
   0x7   :  { %s824_s14 = smov 0   ;;  %s826_s15 = smov 0  }
   0x8   :  { %s828_s16 = smov 0   ;;  %s830_s17 = smov 0  }
   0x9 LB: > { %s514_s18 = sadd.s32 4294967295, %s792_s17   ;;  %s515_s19 = sadd.s32 4294967294, %s792_s17   ;;  %s792_s17 = sphi %s830_s17, %s20_s17   ;;  %s788_s16 = sphi %s828_s16, %s1034_s16   ;;  %s784_s15 = sphi %s826_s15, %s1033_s15   ;;  %s780_s14 = sphi %s824_s14, %s1032_s14   ;;  %s776_s13 = sphi %s822_s13, %s1031_s13   ;;  %s772_s12 = sphi %s820_s12, %s1030_s12  }
   0xa   : > { %p89_p0 = scmp.ne.s32.totalorder %s776_s13, %s772_s12  ;;  %p854_p1 = scmp.eq.s32.totalorder %s514_s18, 0 }
   0xb   : > { %p858_p2 = scmp.eq.s32.totalorder %s514_s18, 1  ;;  %p147_p3 = scmp.eq.s32.totalorder %s515_s19, 1 }
   0xc   : > { %p864_p4 = por %p854_p1, %p89_p0  ;;  %p516_p5 = scmp.ge.s32.totalorder %s792_s17, 1 }
   0xd   : > { %p869_p6 = por %p147_p3, %p89_p0  ;;  %p154_p7 = scmp.lt.s32.totalorder %s792_s17, 3 }
   0xe   : > { %s1025_s0 = sld [smem:[#allocation12_spill]]  ;;  %s794_s28 = smov [#allocation3]  }
   0xf   : > { %p877_p8 = pnand %p516_p5, %p154_p7  ;;  %s173_s29 = sshll.u32 %s794_s28, 4  ;;  %s174_s29 = int_to_ptr.vmem [resolvable:$true] %s173_s29 }
  0x10   : > { %p518_p11 = scmp.ge.s32.totalorder %s792_s17, 2  ;;  %s1019_s30 = smov 256  }
  0x11   : > { %p574_p9 = pneg %p877_p8  ;;  %s796_s4 = smov 16  }
  0x12   : > { %s35_s5 = sadd.s32 1, %s788_s16  ;;  %s76_s6 = sadd.s32 1, %s780_s14 }
  0x13   : > { %p575_p10 = pnand %p574_p9, %p854_p1  ;;  %p37_p12 = scmp.ge.s32.totalorder %s35_s5, 2 }
  0x14   : > { %s171_s26 = sshll.u32 %s1025_s0, 4  ;;  %p83_p13 = scmp.ne.s32.totalorder %s780_s14, %s776_s13  ;;  %s172_s26 = int_to_ptr.hbm [resolvable:$true] %s171_s26 }
  0x15   : > { %577 = dma.hbm_to_vmem [thread:$0]  (!%p575_p10), %s172_s26, 512, %s174_s29, [#allocation4], %s1019_s30, %s1019_s30, %s796_s4  }
  0x16   : > { %p84_p0 = scmp.eq.s32.totalorder %s792_s17, 0  ;;  %s1036_s5 = smov (%p37_p12, %s35_s5), 0 }
  0x17   : > { %p902_p5 = por %p858_p2, %p83_p13  ;;  %s71_s9 = ssub.s32 %s788_s16, %s1036_s5 }
  0x18   : > { %p896_p3 = por %p84_p0, %p83_p13  ;;  %p587_p7 = scmp.lt.s32.totalorder %s792_s17, 2 }
  0x19   : > { %p74_p9 = scmp.eq.s32.totalorder %s71_s9, 0  ;;  %s187_s10 = sand.u32 1, %s780_s14  }
  0x1a   : > { %s519_s11 = sshll.u32 %s187_s10, 8  ;;  %s533_s19 = sshll.u32 %s788_s16, 8 }
  0x1b   : > { %s911_s18 = scalar_select %p74_p9, %s780_s14, %s76_s6  }
  0x1c   : > { %s199_s26 = scalar_lea.hbm %s1016_s1, %s533_s19  ;;  %s191_s28 = scalar_lea.vmem [#allocation6], %s519_s11 }
  0x1d   : > { %s202_s29 = sshll.u32 %s191_s28, 4  ;;  %s200_s21 = sshll.u32 %s199_s26, 4  ;;  %s203_s29 = int_to_ptr.vmem [resolvable:$true] %s202_s29  ;;  %s201_s21 = int_to_ptr.hbm [resolvable:$true] %s200_s21 }
  0x1e   : > { %p579_p2 = pnand %p587_p7, %p896_p3  ;;  %s188_s30 = scalar_lea.sflag [#allocation7], %s187_s10 }
  0x1f   : > { %s1029_s0 = smov 256   ;;  %221 = sbr.rel (%p877_p8) target bundleno = 248 (0xf8), region = 32 }
  0x20   : > { %581 = dma.hbm_to_vmem [thread:$0]  (!%p579_p2), %s201_s21, 4096, %s203_s29, %s188_s30, %s1029_s0, %s1029_s0, %s796_s4  }
  0x24   : > { %759 = dma.done.wait (%p854_p1), [#allocation4], 512  }
  0x25   : > { %761 = vsyncadd (%p854_p1), [#allocation4], 4294966784  ;;  %s929_s6 = sand.u32 1, %s776_s13  }
  0x26   : > { %s525_s7 = sshll.u32 %s929_s6, 8  ;;  %s229_s9 = scalar_lea.sflag [#allocation7], %s929_s6 }
  0x27   : > { %s933_s10 = scalar_lea.vmem [#allocation6], %s525_s7 }
  0x28   : > { %763 = dma.done.wait (%p864_p4), %s229_s9, 4096  }
  0x29   : > { %765 = vsyncadd (%p864_p4), %s229_s9, 4294963200  ;;  %v311_v0 = vld [vmem:[%s933_s10 + $0xf0] sm:$0xff]  ;;  %v312_v1 = vld [vmem:[%s933_s10 + $0xf8] sm:$0xff]  ;;  %p264_p1 = scmp.lt.s32.totalorder %s784_s15, 1  ;;  %s526_s4 = sshll.u32 %s929_s6, 4 }
  0x2a   : > { %534 = vmatpush.xpose.msra.mxu2 %v311_v0  ;;  %550 = vmatpush.xpose.msra.mxu3 %v312_v1  ;;  %v309_v2 = vld [vmem:[%s933_s10 + $0xe0] sm:$0xff]  ;;  %v310_v3 = vld [vmem:[%s933_s10 + $0xe8] sm:$0xff]  ;;  %v307_v4 = vld [vmem:[%s933_s10 + $0xd0] sm:$0xff]  ;;  %s529_s11 = sshll.u32 %s784_s15, 3  ;;  %s259_s26 = scalar_lea.vmem [#allocation8], %s526_s4 }
  0x2b   : > { %313 = vmatpush.xpose.msra.mxu0 %v311_v0  ;;  %336 = vmatpush.xpose.msra.mxu1 %v312_v1  ;;  %v308_v5 = vld [vmem:[%s933_s10 + $0xd8] sm:$0xff]  ;;  %v305_v6 = vld [vmem:[%s933_s10 + $0xc0] sm:$0xff]  ;;  %v306_v7 = vld [vmem:[%s933_s10 + $0xc8] sm:$0xff]  ;;  %s265_s0 = scalar_select %p264_p1, %s784_s15, 1 }
  0x2c   : > { %v303_v8 = vld [vmem:[%s933_s10 + $0xb0] sm:$0xff]  ;;  %v304_v9 = vld [vmem:[%s933_s10 + $0xb8] sm:$0xff]  ;;  %v301_v10 = vld [vmem:[%s933_s10 + $0xa0] sm:$0xff]  ;;  %s392_s25 = scalar_lea.hbm %s1018_s3, %s529_s11  ;;  %s393_s28 = sshll.u32 %s259_s26, 4  ;;  %s394_s28 = int_to_ptr.vmem [resolvable:$true] %s393_s28 }
  0x2d   : > { %v302_v11 = vld [vmem:[%s933_s10 + $0xa8] sm:$0xff]  ;;  %v299_v12 = vld [vmem:[%s933_s10 + $0x90] sm:$0xff]  ;;  %v300_v13 = vld [vmem:[%s933_s10 + $0x98] sm:$0xff]  ;;  %s527_s20 = sshll.u32 %s265_s0, 1  ;;  %s395_s29 = sshll.u32 %s392_s25, 4  ;;  %s396_s29 = int_to_ptr.hbm [resolvable:$true] %s395_s29 }
  0x2e   : > { %535 = vmatpush.xpose.msra.mxu2 %v309_v2  ;;  %551 = vmatpush.xpose.msra.mxu3 %v310_v3  ;;  %v297_v14 = vld [vmem:[%s933_s10 + $0x80] sm:$0xff]  ;;  %v298_v15 = vld [vmem:[%s933_s10 + $0x88] sm:$0xff]  ;;  %v295_v16 = vld [vmem:[%s933_s10 + $0x70] sm:$0xff]  ;;  %s267_s30 = scalar_lea.vmem %s1017_s2, %s527_s20  ;;  %s379_s15 = scalar_lea.sflag [#allocation5], %s929_s6 }
  0x2f   : > { %314 = vmatpush.xpose.msra.mxu0 %v309_v2  ;;  %337 = vmatpush.xpose.msra.mxu1 %v310_v3  ;;  %v296_v17 = vld [vmem:[%s933_s10 + $0x78] sm:$0xff]  ;;  %v293_v18 = vld [vmem:[%s933_s10 + $0x60] sm:$0xff]  ;;  %v294_v19 = vld [vmem:[%s933_s10 + $0x68] sm:$0xff]  ;;  %s720_s21 = sshra.s32 %s396_s29, 4  ;;  %s726_s0 = scalar_lea.hbm %s1018_s3, 32  ;;  %s721_s21 = int_to_ptr.hbm [resolvable:$true] %s720_s21 }
  0x30   : > { %v291_v20 = vld [vmem:[%s933_s10 + $0x50] sm:$0xff]  ;;  %v292_v21 = vld [vmem:[%s933_s10 + $0x58] sm:$0xff]  ;;  %v289_v22 = vld [vmem:[%s933_s10 + $0x40] sm:$0xff]  ;;  %s722_s7 = scalar_lea.hbm %s721_s21, 16  ;;  %p727_p12 = scmp.lt.s32.totalorder %s721_s21, %s1018_s3 }
  0x31   : > { %v290_v23 = vld [vmem:[%s933_s10 + $0x48] sm:$0xff]  ;;  %v287_v24 = vld [vmem:[%s933_s10 + $0x30] sm:$0xff]  ;;  %v288_v25 = vld [vmem:[%s933_s10 + $0x38] sm:$0xff]  ;;  %p723_p4 = scmp.ne.s32.totalorder %s721_s21, %s722_s7  ;;  %p728_p13 = scmp.lt.s32.totalorder %s726_s0, %s722_s7 }
  0x32   : > { %536 = vmatpush.xpose.msra.mxu2 %v307_v4  ;;  %552 = vmatpush.xpose.msra.mxu3 %v308_v5  ;;  %v285_v26 = vld [vmem:[%s933_s10 + $0x20] sm:$0xff]  ;;  %v286_v27 = vld [vmem:[%s933_s10 + $0x28] sm:$0xff]  ;;  %v283_v28 = vld [vmem:[%s933_s10 + $0x10] sm:$0xff] }
  0x33   : > { %315 = vmatpush.xpose.msra.mxu0 %v307_v4  ;;  %338 = vmatpush.xpose.msra.mxu1 %v308_v5  ;;  %v284_v29 = vld [vmem:[%s933_s10 + $0x18] sm:$0xff]  ;;  %v281_v30 = vld [vmem:[%s933_s10] sm:$0xff]  ;;  %v282_v31 = vld [vmem:[%s933_s10 + $0x8] sm:$0xff]  ;;  %p724_p8 = pnand %p723_p4, %p902_p5  ;;  %p729_p0 = por %p728_p13, %p727_p12 }
  0x34   : > { %v279_v32 = vld [vmem:[#allocation3 + $0x10] sm:$0xff]  ;;  %v280_v33 = vld [vmem:[#allocation3 + $0x18] sm:$0xff]  ;;  %v277_v34 = vld [vmem:[#allocation3] sm:$0xff] }
  0x35   : > { %v278_v35 = vld [vmem:[#allocation3 + $0x8] sm:$0xff]  ;;  %v644_v36 = vld [vmem:[%s267_s30] ss:$0 sm:$0xff]  ;;  %v645_v40 = vld [vmem:[%s267_s30 + $0x1] ss:$0 sm:$0xff]  ;;  %p725_p10 = pneg %p724_p8 }
  0x36   : > { %537 = vmatpush.xpose.msra.mxu2 %v305_v6  ;;  %553 = vmatpush.xpose.msra.mxu3 %v306_v7 }
  0x37   : > { %316 = vmatpush.xpose.msra.mxu0 %v305_v6  ;;  %339 = vmatpush.xpose.msra.mxu1 %v306_v7  ;;  %p730_p3 = pnand %p729_p0, %p725_p10 }
  0x3a   : > { %538 = vmatpush.xpose.msra.mxu2 %v303_v8  ;;  %554 = vmatpush.xpose.msra.mxu3 %v304_v9 }
  0x3b   : > { %317 = vmatpush.xpose.msra.mxu0 %v303_v8  ;;  %340 = vmatpush.xpose.msra.mxu1 %v304_v9 }
  0x3e   : > { %539 = vmatpush.xpose.msra.mxu2 %v301_v10  ;;  %555 = vmatpush.xpose.msra.mxu3 %v302_v11 }
  0x3f   : > { %318 = vmatpush.xpose.msra.mxu0 %v301_v10  ;;  %341 = vmatpush.xpose.msra.mxu1 %v302_v11 }
  0x42   : > { %540 = vmatpush.xpose.msra.mxu2 %v299_v12  ;;  %556 = vmatpush.xpose.msra.mxu3 %v300_v13 }
  0x43   : > { %319 = vmatpush.xpose.msra.mxu0 %v299_v12  ;;  %342 = vmatpush.xpose.msra.mxu1 %v300_v13 }
  0x46   : > { %541 = vmatpush.xpose.msra.mxu2 %v297_v14  ;;  %557 = vmatpush.xpose.msra.mxu3 %v298_v15 }
  0x47   : > { %320 = vmatpush.xpose.msra.mxu0 %v297_v14  ;;  %343 = vmatpush.xpose.msra.mxu1 %v298_v15 }
  0x4a   : > { %542 = vmatpush.xpose.msra.mxu2 %v295_v16  ;;  %558 = vmatpush.xpose.msra.mxu3 %v296_v17 }
  0x4b   : > { %321 = vmatpush.xpose.msra.mxu0 %v295_v16  ;;  %344 = vmatpush.xpose.msra.mxu1 %v296_v17 }
  0x4e   : > { %543 = vmatpush.xpose.msra.mxu2 %v293_v18  ;;  %559 = vmatpush.xpose.msra.mxu3 %v294_v19 }
  0x4f   : > { %322 = vmatpush.xpose.msra.mxu0 %v293_v18  ;;  %345 = vmatpush.xpose.msra.mxu1 %v294_v19 }
  0x52   : > { %544 = vmatpush.xpose.msra.mxu2 %v291_v20  ;;  %560 = vmatpush.xpose.msra.mxu3 %v292_v21 }
  0x53   : > { %323 = vmatpush.xpose.msra.mxu0 %v291_v20  ;;  %346 = vmatpush.xpose.msra.mxu1 %v292_v21 }
  0x56   : > { %545 = vmatpush.xpose.msra.mxu2 %v289_v22  ;;  %561 = vmatpush.xpose.msra.mxu3 %v290_v23 }
  0x57   : > { %324 = vmatpush.xpose.msra.mxu0 %v289_v22  ;;  %347 = vmatpush.xpose.msra.mxu1 %v290_v23 }
  0x5a   : > { %546 = vmatpush.xpose.msra.mxu2 %v287_v24  ;;  %562 = vmatpush.xpose.msra.mxu3 %v288_v25 }
  0x5b   : > { %325 = vmatpush.xpose.msra.mxu0 %v287_v24  ;;  %348 = vmatpush.xpose.msra.mxu1 %v288_v25 }
  0x5e   : > { %547 = vmatpush.xpose.msra.mxu2 %v285_v26  ;;  %563 = vmatpush.xpose.msra.mxu3 %v286_v27 }
  0x5f   : > { %326 = vmatpush.xpose.msra.mxu0 %v285_v26  ;;  %349 = vmatpush.xpose.msra.mxu1 %v286_v27 }
  0x62   : > { %548 = vmatpush.xpose.msra.mxu2 %v283_v28  ;;  %564 = vmatpush.xpose.msra.mxu3 %v284_v29 }
  0x63   : > { %327 = vmatpush.xpose.msra.mxu0 %v283_v28  ;;  %350 = vmatpush.xpose.msra.mxu1 %v284_v29 }
  0x66   : > { %549 = vmatpush.xpose.msra.mxu2 %v281_v30  ;;  %565 = vmatpush.xpose.msra.mxu3 %v282_v31 }
  0x67   : > { %328 = vmatpush.xpose.msra.mxu0 %v281_v30  ;;  %351 = vmatpush.xpose.msra.mxu1 %v282_v31 }
  0x69   : > { %332 = vmatmul.f32.vlgmr.msra.gmra.mxu2 %v279_v32  ;;  %355 = vmatmul.f32.vlgmr.msra.gmra.mxu3 %v280_v33 }
  0x6a   : > { %329 = vmatmul.f32.vlgmr.msra.gmra.mxu0 %v277_v34  ;;  %352 = vmatmul.f32.vlgmr.msra.gmra.mxu1 %v278_v35 }
  0xe7   : > { %v330_v37 = vpop.f32.mrf.mxu0  ;;  %v353_v38 = vpop.f32.mrf.mxu1 }
  0xe8   : > { %v354_v39 = vadd.f32 %v353_v38, %v330_v37 }
  0xea   : > { %v371_v41 = vmul.f32 %v644_v36, %v354_v39 }
  0xec   : > { %v333_v42 = vpop.f32.mrf.mxu2  ;;  %v374_v43 = vadd.f32 %v645_v40, %v371_v41  ;;  %v356_v44 = vpop.f32.mrf.mxu3 }
  0xed   : > { %v357_v45 = vadd.f32 %v356_v44, %v333_v42 }
  0xee   : > { %376 = vst [vmem:[%s259_s26] sm:$0xff] %v374_v43 }
  0xef   : > { %v372_v46 = vmul.f32 %v644_v36, %v357_v45 }
  0xf1   : > { %v375_v47 = vadd.f32 %v645_v40, %v372_v46 }
  0xf3   : > { %377 = vst [vmem:[%s259_s26 + $0x8] sm:$0xff] %v375_v47 }
  0xf4   : > { %733 = shalt.err (!%p730_p3)
}
  0xf5   : > { %s797_s6 = smov 128   ;;  %s798_s27 = smov 256  }
  0xf6   : > { %s799_s30 = smov 8  }
  0xf7   : > { %572 = dma.vmem_to_hbm [thread:$0]  (%p902_p5), %s394_s28, 256, %s396_s29, %s379_s15, %s797_s6, %s798_s27, %s799_s30  }
  0xf8 PF: > { %s410_s4 = sand.u32 1, %s772_s12   ;;  %p583_p7 = pnand %p518_p11, %p869_p6 }
  0xf9   : > { %s411_s11 = scalar_lea.sflag [#allocation5], %s410_s4 }
  0xfa   : > { %p584_p9 = pneg %p583_p7 }
  0xfc   : > { %767 = dma.done.wait (%p584_p9), %s411_s11, 256  }
  0xfd   : > { %769 = vsyncadd (%p584_p9), %s411_s11, 4294967040  ;;  %s20_s17 = sadd.s32 1, %s792_s17   ;;  %s1030_s12 = smov %s776_s13 }
  0xfe   : > { %p17_p2 = scmp.ge.s32.totalorder %s20_s17, 4   ;;  %s1031_s13 = smov %s780_s14 }
  0xff   : > { %s1032_s14 = smov %s911_s18  ;;  %s1033_s15 = smov %s788_s16 }
 0x100   : > { %s1034_s16 = smov %s1036_s5  ;;  %19 = sbr.rel (!%p17_p2) target bundleno = 9 (0x9), region = 94 }
 0x105   :  { %417 = vsyncpa [#allocation4], 1 }
 0x106   :  { %419 = vsyncpa [#allocation4 + $0x1], 1 }
 0x107   :  { %420 = vsyncpa [#allocation7], 1 }
 0x108   :  { %422 = vsyncpa [#allocation7 + $0x1], 1 }
 0x109   :  { %423 = vsyncpa [#allocation5], 1 }
 0x10a   :  { %425 = vsyncpa [#allocation5 + $0x1], 1 }

</bundles_post_ra>
